<compile_context>
chip_gen: v7x
topology: tpu7x:2x2x1
jax: 0.10.0
libtpu: 0.0.40
codegen_flags: <defaults>
</compile_context>

<pallas_src>
import functools

import jax
import jax.numpy as jnp
from jax.experimental import pallas as pl
from jax.experimental.pallas import tpu as pltpu

_LANES = 128
_SUBLANES = 8


def _testfunc_kernel(n_valid_last, chunk_rows, x_ref, s1_ref, s2_ref):
    """Per-block lane-dense partial sums of (x1 - x^2)^2 and (1 - x)^2.

    x_ref  : (rows_per_block, 128) f32 VMEM tile of the reshaped input
    s1_ref : (1, 8, 128) f32 VMEM  -- this block's partial of (x1 - x^2)^2
    s2_ref : (1, 8, 128) f32 VMEM  -- this block's partial of (1 - x)^2

    The flat-order predecessor of every element comes from two XLU rotates on
    (chunk_rows, 128) sub-tiles.  The predecessor of the block's very first
    element is deliberately taken as 0.0; the wrapper corrects those few terms,
    which keeps blocks independent so the grid can run in parallel.
    n_valid_last / chunk_rows are static Python ints (bound via partial).
    """
    rows, lanes = x_ref.shape
    block_elems = rows * lanes
    chunk_elems = chunk_rows * lanes

    # Loop-invariant helper masks (tiny, per kernel invocation).
    lane_iota = jax.lax.broadcasted_iota(jnp.int32, (chunk_rows, lanes), 1)
    is_lane0 = lane_iota == 0
    row_iota1 = jax.lax.broadcasted_iota(jnp.int32, (chunk_rows, 1), 0)
    is_row0 = row_iota1 == 0

    def run(num_chunks, flat_limit):
        # flat_limit: None (all elements valid) or static int -> mask
        # flat indices >= flat_limit (only used for the single padded block).
        if flat_limit is not None:
            off = (jax.lax.broadcasted_iota(jnp.int32, (chunk_rows, lanes), 0)
                   * lanes + lane_iota)

        def body(g, state):
            p1, p2, carry = state
            start = pl.multiple_of(g * chunk_rows, chunk_rows)
            xg = x_ref[pl.ds(start, chunk_rows), :]
            # Flat-order predecessor via XLU rotates (lane roll + sublane roll).
            lane_rolled = pltpu.roll(xg, shift=1, axis=1)   # right for lane>=1
            both_rolled = pltpu.roll(lane_rolled, shift=1, axis=0)
            # Column 0: predecessor of (r, 0) is xg[r-1, 127]; for r == 0 it is
            # the previous chunk's last element, carried through the loop
            # (the very first chunk starts with 0.0 -- patched in the wrapper).
            col_prev = jnp.where(is_row0, carry, both_rolled[:, 0:1])
            x1 = jnp.where(is_lane0, col_prev, lane_rolled)
            xx = xg * xg
            d = x1 - xx
            omx = 1.0 - xg
            t1 = d * d
            t2 = omx * omx
            if flat_limit is not None:
                mask = off < (flat_limit - g * chunk_elems)
                t1 = jnp.where(mask, t1, 0.0)
                t2 = jnp.where(mask, t2, 0.0)
            new_carry = both_rolled[0:1, 0:1]        # == xg[-1, -1]
            return p1 + t1, p2 + t2, new_carry

        init = (jnp.zeros((chunk_rows, lanes), jnp.float32),
                jnp.zeros((chunk_rows, lanes), jnp.float32),
                jnp.zeros((1, 1), jnp.float32))
        p1, p2, _ = jax.lax.fori_loop(0, num_chunks, body, init)
        return p1, p2

    def fold8(p):                                    # (chunk_rows,128)->(8,128)
        acc = p[0:_SUBLANES, :]
        for k in range(1, chunk_rows // _SUBLANES):
            acc = acc + p[k * _SUBLANES:(k + 1) * _SUBLANES, :]
        return acc

    def write(p1, p2):
        s1_ref[...] = fold8(p1).reshape(1, _SUBLANES, lanes)
        s2_ref[...] = fold8(p2).reshape(1, _SUBLANES, lanes)

    if n_valid_last == block_elems:
        # Every element of every block is valid: pure streaming, no masking.
        write(*run(rows // chunk_rows, None))
    else:
        # Single (padded) block: touch only the chunks that hold valid rows.
        valid_rows = -(-n_valid_last // lanes)
        num_chunks = -(-valid_rows // chunk_rows)
        write(*run(num_chunks, n_valid_last))


def _block_partial_sums(x2d, rows_per_block, num_blocks, n_valid_last):
    """Run the kernel over `num_blocks` blocks of x2d; return (sum1, sum2)."""
    assert rows_per_block % _SUBLANES == 0
    assert num_blocks == 1 or n_valid_last == rows_per_block * _LANES
    chunk_rows = 32 if rows_per_block % 32 == 0 else _SUBLANES
    kernel = functools.partial(_testfunc_kernel, n_valid_last, chunk_rows)

    s1_blocks, s2_blocks = pl.pallas_call(
        kernel,
        out_shape=(
            jax.ShapeDtypeStruct((num_blocks, _SUBLANES, _LANES), jnp.float32),
            jax.ShapeDtypeStruct((num_blocks, _SUBLANES, _LANES), jnp.float32),
        ),
        grid_spec=pltpu.PrefetchScalarGridSpec(
            num_scalar_prefetch=0,
            grid=(num_blocks,),
            in_specs=[
                pl.BlockSpec((rows_per_block, _LANES), lambda i: (i, 0)),
            ],
            out_specs=(
                pl.BlockSpec((1, _SUBLANES, _LANES), lambda i: (i, 0, 0)),
                pl.BlockSpec((1, _SUBLANES, _LANES), lambda i: (i, 0, 0)),
            ),
        ),
        # Blocks are fully independent -> let the grid shard across TCs (v7x).
        compiler_params=pltpu.CompilerParams(
            dimension_semantics=("parallel",)),
    )(x2d)
    return jnp.sum(s1_blocks), jnp.sum(s2_blocks)


def testfunc_forward(x: jax.Array, alpha: jax.Array,
                     *, block_rows: int = 2048) -> jax.Array:
    """x: (N,) f32, alpha: (1,) f32 -> scalar f32 (shape ()).

    Matches torch.sum(alpha * (roll(x, 1) - x**2)**2 + (1 - x)**2, 0).
    """
    x = x.astype(jnp.float32)
    n = int(x.shape[0])
    assert 1 <= n < 2 ** 31          # int32 flat indexing inside the kernel
    alpha_s = jnp.asarray(alpha, jnp.float32).reshape(())

    tail_x = None
    tail_prev = None

    if n <= block_rows * _LANES:
        # Whole input fits in one block: pad only up to the next (8,128) tile
        # multiple (<= one block; zero-copy bitcast when already aligned) and
        # element-mask inside the kernel.
        rows = -(-n // _LANES)
        rows8 = max(_SUBLANES, -(-rows // _SUBLANES) * _SUBLANES)
        pad = rows8 * _LANES - n
        x2d = (x if pad == 0 else jnp.pad(x, (0, pad))).reshape(rows8, _LANES)
        s1, s2 = _block_partial_sums(x2d, rows8, 1, n)
        block_starts = [0]
    else:
        # Large input: never materialize a padded copy of the whole array.
        tail_len = n % _LANES
        n_kernel = n - tail_len
        if tail_len == 0:
            x2d = x.reshape(n_kernel // _LANES, _LANES)   # zero-copy bitcast
        else:
            # Only the lane-aligned prefix feeds the kernel; the <128-element
            # ragged tail is handled by the tiny jnp epilogue below.
            # TODO(synk): XLA may still materialize this prefix slice; a truly
            # zero-copy unaligned path would need a 1-D manual-DMA kernel.
            x2d = jax.lax.slice(x, (0,), (n_kernel,)).reshape(
                n_kernel // _LANES, _LANES)
            tail_x = jax.lax.slice(x, (n_kernel,), (n,))
            tail_prev = jax.lax.slice(x, (n_kernel - 1,), (n - 1,))

        total_rows = x2d.shape[0]
        block_elems = block_rows * _LANES
        full_blocks = total_rows // block_rows
        rem_rows = total_rows - full_blocks * block_rows

        # (a) completely-full blocks: one parallel, completely unmasked grid.
        s1, s2 = _block_partial_sums(x2d, block_rows, full_blocks,
                                     block_rows * _LANES)
        block_starts = [k * block_elems for k in range(full_blocks)]

        # (b) leftover rows (< block_rows): one small masked block.  The slice
        #     touches at most one block (<= 1 MiB), never the whole array.
        if rem_rows:
            rest = jax.lax.slice(x2d, (full_blocks * block_rows, 0),
                                 (total_rows, _LANES))
            rem8 = -(-rem_rows // _SUBLANES) * _SUBLANES
            if rem8 != rem_rows:
                rest = jnp.pad(rest, ((0, rem8 - rem_rows), (0, 0)))
            a, b = _block_partial_sums(rest, rem8, 1, rem_rows * _LANES)
            s1 = s1 + a
            s2 = s2 + b
            block_starts.append(full_blocks * block_elems)

    # Each kernel block assumed its first element's predecessor was 0.0 (this
    # is what keeps the grid parallel).  Patch those num_blocks terms here and
    # close the roll(+1) ring with x[N-1].
    first_idx = jnp.asarray(block_starts, dtype=jnp.int32)
    prev_idx = jnp.mod(first_idx - 1, n)              # block 0 -> x[N-1]
    xf = jnp.take(x, first_idx)
    xp = jnp.take(x, prev_idx)
    xf2 = xf * xf
    s1 = s1 + jnp.sum((xp - xf2) ** 2 - xf2 * xf2)

    if tail_x is not None:                             # <128-element epilogue
        td = tail_prev - tail_x * tail_x
        s1 = s1 + jnp.sum(td * td)
        s2 = s2 + jnp.sum((1.0 - tail_x) ** 2)

    # alpha hoisted out of the per-element kernel math; applied exactly once.
    return alpha_s * s1 + s2


if __name__ == "__main__":
    key = jax.random.PRNGKey(0)
    # Deterministic parameter init matching nn.Parameter(torch.tensor([100.0])).
    alpha = jnp.array([100.0], dtype=jnp.float32)

    def reference(xv, al):
        return jnp.sum(al * (jnp.roll(xv, 1) - xv ** 2) ** 2 + (1.0 - xv) ** 2)

    # Module-consistent tiny input: torch.rand(2) * 5.
    x_small = jax.random.uniform(key, (2,), dtype=jnp.float32) * 5.0
    out_small = jax.block_until_ready(testfunc_forward(x_small, alpha))
    ref_small = reference(x_small, alpha)
    assert out_small.shape == ()
    assert jnp.allclose(out_small, ref_small, rtol=1e-4, atol=1e-3), (
        out_small, ref_small)

    # Single-block, lane-unaligned input: exercises the padded/masked path.
    x_mid = jax.random.uniform(jax.random.PRNGKey(1), (1000,),
                               dtype=jnp.float32) * 2.0
    out_mid = jax.block_until_ready(testfunc_forward(x_mid, alpha))
    ref_mid = reference(x_mid, alpha)
    assert jnp.allclose(out_mid, ref_mid, rtol=1e-4, atol=1e-2), (
        out_mid, ref_mid)

    # Multi-block input: parallel grid over full blocks, leftover-row block,
    # block-boundary patches, and the ragged-tail epilogue (N % 128 != 0).
    n_big = 2 * 2048 * 128 + 64 * 128 + 77
    x_big = jax.random.uniform(jax.random.PRNGKey(2), (n_big,),
                               dtype=jnp.float32) * 2.0
    out_big = jax.block_until_ready(testfunc_forward(x_big, alpha))
    ref_big = reference(x_big, alpha)
    assert jnp.allclose(out_big, ref_big, rtol=1e-3), (out_big, ref_big)

    print("KERNEL_OK")
</pallas_src>

<mosaic_0001>
module attributes {stable_mosaic.version = 11 : i64} {
  func.func @_testfunc_kernel(%arg0: i32, %arg1: memref<8x128xf32, #tpu.memory_space<vmem>>, %arg2: memref<1x8x128xf32, #tpu.memory_space<vmem>>, %arg3: memref<1x8x128xf32, #tpu.memory_space<vmem>>) attributes {dimension_semantics = [#tpu.dimension_semantics<parallel>], iteration_bounds = array<i64: 1>, scalar_prefetch = 0 : i64, scratch_operands = 0 : i64, tpu.core_type = #tpu.core_type<tc>, window_params = [{transform_indices = @transform_0, window_bounds = array<i64: 8, 128>}, {transform_indices = @transform_1, window_bounds = array<i64: 1, 8, 128>}, {transform_indices = @transform_2, window_bounds = array<i64: 1, 8, 128>}]} {
    %0 = tpu.iota {dimensions = array<i32: 1>} : vector<8x128xi32>
    %c0_i32 = arith.constant 0 : i32
    %1 = vector.broadcast %c0_i32 : i32 to vector<8x128xi32>
    %2 = arith.cmpi eq, %0, %1 : vector<8x128xi32>
    %3 = tpu.iota {dimensions = array<i32: 0>} : vector<8x1xi32>
    %c0_i32_0 = arith.constant 0 : i32
    %4 = vector.broadcast %c0_i32_0 : i32 to vector<8x1xi32>
    %5 = arith.cmpi eq, %3, %4 : vector<8x1xi32>
    %6 = tpu.iota {dimensions = array<i32: 0>} : vector<8x128xi32>
    %c128_i32 = arith.constant 128 : i32
    %7 = vector.broadcast %c128_i32 : i32 to vector<8x128xi32>
    %8 = arith.muli %6, %7 : vector<8x128xi32>
    %9 = arith.addi %8, %0 : vector<8x128xi32>
    %cst = arith.constant 0.000000e+00 : f32
    %10 = vector.broadcast %cst : f32 to vector<8x128xf32>
    %cst_1 = arith.constant 0.000000e+00 : f32
    %11 = vector.broadcast %cst_1 : f32 to vector<8x128xf32>
    %cst_2 = arith.constant 0.000000e+00 : f32
    %12 = vector.broadcast %cst_2 : f32 to vector<1x1xf32>
    %c0_i32_3 = arith.constant 0 : i32
    %c8_i32 = arith.constant 8 : i32
    %13 = arith.muli %c0_i32_3, %c8_i32 : i32
    %14 = tpu.assume_multiple %13, 8 : i32
    %15 = arith.index_cast %14 : i32 to index
    %c0 = arith.constant 0 : index
    %16 = vector.load %arg1[%15, %c0] : memref<8x128xf32, #tpu.memory_space<vmem>>, vector<8x128xf32>
    %c1_i32 = arith.constant 1 : i32
    %17 = tpu.dynamic_rotate %16 by %c1_i32 dim 1 : vector<8x128xf32>, i32 -> vector<8x128xf32>
    %c1_i32_4 = arith.constant 1 : i32
    %18 = tpu.dynamic_rotate %17 by %c1_i32_4 dim 0 : vector<8x128xf32>, i32 -> vector<8x128xf32>
    %19 = vector.extract_strided_slice %18 {offsets = [0, 0], sizes = [8, 1], strides = [1, 1]} : vector<8x128xf32> to vector<8x1xf32>
    %20 = vector.shape_cast %12 : vector<1x1xf32> to vector<1x1xf32>
    %21 = vector.broadcast %20 : vector<1x1xf32> to vector<8x1xf32>
    %22 = arith.select %5, %21, %19 : vector<8x1xi1>, vector<8x1xf32>
    %23 = vector.shape_cast %22 : vector<8x1xf32> to vector<8x1xf32>
    %24 = vector.broadcast %23 : vector<8x1xf32> to vector<8x128xf32>
    %25 = arith.select %2, %24, %17 : vector<8x128xi1>, vector<8x128xf32>
    %26 = arith.mulf %16, %16 : vector<8x128xf32>
    %27 = arith.subf %25, %26 : vector<8x128xf32>
    %cst_5 = arith.constant 1.000000e+00 : f32
    %28 = vector.broadcast %cst_5 : f32 to vector<8x128xf32>
    %29 = arith.subf %28, %16 : vector<8x128xf32>
    %30 = arith.mulf %27, %27 : vector<8x128xf32>
    %31 = arith.mulf %29, %29 : vector<8x128xf32>
    %c1024_i32 = arith.constant 1024 : i32
    %32 = arith.muli %c0_i32_3, %c1024_i32 : i32
    %c2_i32 = arith.constant 2 : i32
    %33 = arith.subi %c2_i32, %32 : i32
    %34 = vector.broadcast %33 : i32 to vector<8x128xi32>
    %35 = arith.cmpi slt, %9, %34 : vector<8x128xi32>
    %cst_6 = arith.constant 0.000000e+00 : f32
    %36 = vector.broadcast %cst_6 : f32 to vector<8x128xf32>
    %37 = arith.select %35, %30, %36 : vector<8x128xi1>, vector<8x128xf32>
    %cst_7 = arith.constant 0.000000e+00 : f32
    %38 = vector.broadcast %cst_7 : f32 to vector<8x128xf32>
    %39 = arith.select %35, %31, %38 : vector<8x128xi1>, vector<8x128xf32>
    %40 = vector.extract_strided_slice %18 {offsets = [0, 0], sizes = [1, 1], strides = [1, 1]} : vector<8x128xf32> to vector<1x1xf32>
    %41 = arith.addf %10, %37 : vector<8x128xf32>
    %42 = arith.addf %11, %39 : vector<8x128xf32>
    %c1_i32_8 = arith.constant 1 : i32
    %43 = vector.shape_cast %41 : vector<8x128xf32> to vector<1x8x128xf32>
    %c0_9 = arith.constant 0 : index
    %c0_10 = arith.constant 0 : index
    %c0_11 = arith.constant 0 : index
    %44 = vector.load %arg2[%c0_9, %c0_10, %c0_11] : memref<1x8x128xf32, #tpu.memory_space<vmem>>, vector<1x8x128xf32>
    tpu.vector_store %arg2[%c0_9, %c0_10, %c0_11], %43 {strides = array<i32>} : memref<1x8x128xf32, #tpu.memory_space<vmem>>, vector<1x8x128xf32>,
    %45 = vector.shape_cast %42 : vector<8x128xf32> to vector<1x8x128xf32>
    %c0_12 = arith.constant 0 : index
    %c0_13 = arith.constant 0 : index
    %c0_14 = arith.constant 0 : index
    %46 = vector.load %arg3[%c0_12, %c0_13, %c0_14] : memref<1x8x128xf32, #tpu.memory_space<vmem>>, vector<1x8x128xf32>
    tpu.vector_store %arg3[%c0_12, %c0_13, %c0_14], %45 {strides = array<i32>} : memref<1x8x128xf32, #tpu.memory_space<vmem>>, vector<1x8x128xf32>,
    return
  }
  func.func @transform_0(%arg0: i32) -> (i32, i32) {
    %c0_i32 = arith.constant 0 : i32
    %c0_i32_0 = arith.constant 0 : i32
    return %arg0, %c0_i32 : i32, i32
  }
  func.func @transform_1(%arg0: i32) -> (i32, i32, i32) {
    %c0_i32 = arith.constant 0 : i32
    %c0_i32_0 = arith.constant 0 : i32
    %c0_i32_1 = arith.constant 0 : i32
    return %arg0, %c0_i32, %c0_i32_0 : i32, i32, i32
  }
  func.func @transform_2(%arg0: i32) -> (i32, i32, i32) {
    %c0_i32 = arith.constant 0 : i32
    %c0_i32_0 = arith.constant 0 : i32
    %c0_i32_1 = arith.constant 0 : i32
    return %arg0, %c0_i32, %c0_i32_0 : i32, i32, i32
  }
}

</mosaic_0001>

<bundles_post_ra>
// kernel: tpu_custom_call.1
= control target key start
LH: loop header
LB: loop body
LE: loop exit
PB: predicated region body
PF: predicated region fallthrough
CT: control target
= control target key end

     0   :  { %8 = vsyncpa [#allocation3], 0  ;;  %s220_s0 = inlined_call_operand.hbm [shape: f32[8,128], index: 0, kind: input, shape index: {}]   ;;  %s221_s1 = inlined_call_operand.hbm [shape: f32[1,8,128], index: 1, kind: output, shape index: {0}]   ;;  %s222_s2 = inlined_call_operand.hbm [shape: f32[1,8,128], index: 2, kind: output, shape index: {1}]  }
   0x1   :  { %9 = vsyncpa [#allocation4], 0 }
   0x2   :  { %10 = vsyncpa [#allocation7], 0  ;;  %s162_s9 = smov [#allocation2]   ;;  %s90_s13 = scalar_lea.hbm %s220_s0, 128 }
   0x3   :  { %s17_s10 = sshll.u32 %s162_s9, 4  ;;  %p91_p0 = scmp.ne.s32.totalorder %s220_s0, %s90_s13  ;;  %s18_s10 = int_to_ptr.vmem [resolvable:$true] %s17_s10 }
   0x4   :  { %p94_p1 = scmp.lt.u32.totalorder %s90_s13, %s220_s0 }
   0x6   :  { %p96_p2 = pnand %p94_p1, %p91_p0 }
   0x8   :  { %99 = shalt.err (!%p96_p2)
}
   0x9   :  { %s100_s18 = scalar_lea.vmem %s18_s10, 128  ;;  %p105_p4 = scmp.lt.s32.totalorder %s18_s10, %s18_s10 }
   0xa   :  { %p101_p3 = scmp.ne.s32.totalorder %s18_s10, %s100_s18  ;;  %p106_p5 = scmp.lt.s32.totalorder %s100_s18, %s100_s18 }
   0xc   :  { %p107_p6 = por %p106_p5, %p105_p4 }
   0xe   :  { %p108_p7 = pnand %p107_p6, %p101_p3 }
  0x10   :  { %111 = shalt.err (!%p108_p7)
}
  0x11   :  { %20 = dma.hbm_to_vmem [thread:$0]  %s220_s0, 128, %s18_s10, [#allocation3]  }
  0x12   :  { %156 = dma.done.wait [#allocation3], 128  }
  0x13   :  { %157 = vsyncadd [#allocation3], 4294967168  ;;  %v163_v0 = vmov 0   ;;  %v32_v1 = vld [vmem:[#allocation2] sm:$0xff]  ;;  %s164_s21 = smov 1   ;;  %v24_v2 = vlaneseq  ;;  %s165_s0 = smov [#allocation6]  }
  0x14   :  { %89 = vset.pattern.permute.xlu0 %v163_v0  ;;  %v45_v5 = vsub.f32 1.0, %v32_v1  ;;  %s71_s22 = sshll.u32 %s165_s0, 4  ;;  %s72_s22 = int_to_ptr.vmem [resolvable:$true] %s71_s22 }
  0x15   :  { %33 = vrot.lane.b32.xlu0 %v32_v1, %s164_s21  ;;  %v28_v3 = vshrl.u32 %v24_v2, 7  ;;  %v25_v8 = vand.u32 127, %v24_v2  ;;  %s112_s23 = scalar_lea.vmem %s72_s22, 128  ;;  %p117_p9 = scmp.lt.s32.totalorder %s72_s22, %s72_s22 }
  0x16   :  { %v47_v10 = vmul.f32 %v45_v5, %v45_v5  ;;  %p113_p8 = scmp.ne.s32.totalorder %s72_s22, %s112_s23  ;;  %p118_p10 = scmp.lt.s32.totalorder %s112_s23, %s112_s23 }
  0x17   :  { %vm29_vm0 = vcmp.eq.s32.totalorder %v28_v3, 0  ;;  %v30_v9 = vmul.u32 128, %v28_v3 }
  0x18   :  { %p119_p11 = por %p118_p10, %p117_p9 }
  0x19   :  { %v31_v11 = vadd.s32 %v30_v9, %v25_v8 }
  0x1a   :  { %p120_p12 = pnand %p119_p11, %p113_p8 }
  0x1b   :  { %vm48_vm1 = vcmp.lt.s32.totalorder %v31_v11, 2 }
  0x1c   :  { %v50_v12 = vsel %vm48_vm1, %v47_v10, 0.0 }
  0x1d   :  { %54 = vst [vmem:[#allocation6] sm:$0xff] %v50_v12 }
  0x87   :  { %v34_v4 = vpop.permute.xlu0 %33 }
  0x88   :  { %v35_v6 = vrot.slane %v34_v4, 7 }
  0x8a   :  { %v36_v7 = vsel %vm29_vm0, 0.0, %v35_v6 }
  0x8b   :  { %39 = vperm.xlu0 %89, %v36_v7  }
  0x8c   :  { %123 = shalt.err (!%p120_p12)
}
  0x8d   :  { %s124_s26 = scalar_lea.hbm %s222_s2, 128 }
  0x8e   :  { %p125_p13 = scmp.ne.s32.totalorder %s222_s2, %s124_s26  ;;  %p128_p0 = scmp.lt.u32.totalorder %s124_s26, %s222_s2 }
  0x90   :  { %p130_p1 = pnand %p128_p0, %p125_p13 }
  0x92   :  { %133 = shalt.err (!%p130_p1)
}
  0x93   :  { %74 = dma.vmem_to_hbm [thread:$0]  %s72_s22, 128, %s222_s2, [#allocation7]   ;;  %v43_v13 = vmul.f32 %v32_v1, %v32_v1  ;;  %vm26_vm2 = vcmp.eq.s32.totalorder %v25_v8, 0 }
  0x94   :  { %s166_s5 = smov [#allocation5]  }
  0x95   :  { %s61_s6 = sshll.u32 %s166_s5, 4  ;;  %s62_s6 = int_to_ptr.vmem [resolvable:$true] %s61_s6 }
  0x96   :  { %s134_s7 = scalar_lea.vmem %s62_s6, 128  ;;  %p139_p3 = scmp.lt.s32.totalorder %s62_s6, %s62_s6 }
  0x97   :  { %p135_p2 = scmp.ne.s32.totalorder %s62_s6, %s134_s7  ;;  %p140_p4 = scmp.lt.s32.totalorder %s134_s7, %s134_s7 }
  0x99   :  { %p141_p5 = por %p140_p4, %p139_p3 }
  0x9b   :  { %p142_p6 = pnand %p141_p5, %p135_p2 }
 0x10a   :  { %v40_v14 = vpop.permute.xlu0 %39 }
 0x10b   :  { %v42_v15 = vsel %vm26_vm2, %v40_v14, %v34_v4 }
 0x10c   :  { %v44_v16 = vsub.f32 %v42_v15, %v43_v13 }
 0x10e   :  { %v46_v17 = vmul.f32 %v44_v16, %v44_v16 }
 0x110   :  { %v49_v18 = vsel %vm48_vm1, %v46_v17, 0.0 }
 0x111   :  { %53 = vst [vmem:[#allocation5] sm:$0xff] %v49_v18 }
 0x112   :  { %145 = shalt.err (!%p142_p6)
}
 0x113   :  { %s146_s9 = scalar_lea.hbm %s221_s1, 128 }
 0x114   :  { %p147_p7 = scmp.ne.s32.totalorder %s221_s1, %s146_s9  ;;  %p150_p8 = scmp.lt.u32.totalorder %s146_s9, %s221_s1 }
 0x116   :  { %p152_p9 = pnand %p150_p8, %p147_p7 }
 0x118   :  { %155 = shalt.err (!%p152_p9)
}
 0x119   :  { %64 = dma.vmem_to_hbm [thread:$0]  %s62_s6, 128, %s221_s1, [#allocation4]  }
 0x11a   :  { %158 = dma.done.wait [#allocation4], 128  }
 0x11b   :  { %159 = vsyncadd [#allocation4], 4294967168 }
 0x11c   :  { %160 = dma.done.wait [#allocation7], 128  }
 0x11d   :  { %161 = vsyncadd [#allocation7], 4294967168 }
 0x11e   :  { %81 = vsyncpa [#allocation3], 1 }
 0x11f   :  { %82 = vsyncpa [#allocation4], 1 }
 0x120   :  { %83 = vsyncpa [#allocation7], 1 }

</bundles_post_ra>
